<compile_context>
chip_gen: v7x
topology: tpu7x:2x2x1
jax: 0.10.0
libtpu: 0.0.40
codegen_flags: <defaults>
</compile_context>

<pallas_src>
import jax
import jax.numpy as jnp
from jax import lax
from jax.experimental import pallas as pl
from jax.experimental.pallas import tpu as pltpu


def _round_up(x, m):
    return (x + m - 1) // m * m


def mlp_kernel(x_ref, w1_ref, b1_ref, w2_ref, b2_ref, o_ref):
    # Hidden layer: x @ W1 + b1, ReLU (f32 accumulate on the MXU).
    h = jnp.dot(x_ref[...], w1_ref[...],
                preferred_element_type=jnp.float32,
                precision=lax.Precision.HIGHEST)
    h = jnp.maximum(h + b1_ref[...], 0.0)            # b1 is (1, Hp), broadcasts
    # Output layer: h @ W2 + b2.
    out = jnp.dot(h, w2_ref[...],
                  preferred_element_type=jnp.float32,
                  precision=lax.Precision.HIGHEST)
    o_ref[...] = (out + b2_ref[...]).astype(o_ref.dtype)


def neural_net_forward(x, w1, b1, w2, b2, *, tile_b=2048, min_tiles=2):
    """x: (B, obs), w1: (obs, Hp), b1: (1, Hp), w2: (Hp, n_actions),
       b2: (1, n_actions) -> (B, n_actions).  Params are already padded
       (hidden -> Hp) once at init; x / output stay unpadded in HBM."""
    B, obs = x.shape
    hid_p = w1.shape[1]
    n_actions = w2.shape[1]

    # Batch tile: multiple of 8 sublanes, capped at tile_b, and also capped so
    # the grid has >= min_tiles tiles when B is large enough (v7x megacore).
    tb_cap = max(8, _round_up(pl.cdiv(B, min_tiles), 8))
    tb = max(8, min(_round_up(tile_b, 8), tb_cap))
    grid = pl.cdiv(B, tb)    # partial last block handled by Pallas (masked store)

    return pl.pallas_call(
        mlp_kernel,
        out_shape=jax.ShapeDtypeStruct((B, n_actions), x.dtype),
        grid=(grid,),
        in_specs=[
            pl.BlockSpec((tb, obs), lambda i: (i, 0)),            # x tile (pipelined)
            pl.BlockSpec((obs, hid_p), lambda i: (0, 0)),         # W1 (VMEM-resident)
            pl.BlockSpec((1, hid_p), lambda i: (0, 0)),           # b1 (resident)
            pl.BlockSpec((hid_p, n_actions), lambda i: (0, 0)),   # W2 (resident)
            pl.BlockSpec((1, n_actions), lambda i: (0, 0)),       # b2 (resident)
        ],
        out_specs=pl.BlockSpec((tb, n_actions), lambda i: (i, 0)),
        compiler_params=pltpu.CompilerParams(
            dimension_semantics=("parallel",)),                   # megacore on v7x
    )(x, w1, b1, w2, b2)


def init_params(key, obs_size, hidden_size, n_actions):
    """Deterministic init mimicking torch.nn.Linear (uniform +/- 1/sqrt(fan_in)),
    weights stored as (in_features, out_features)."""
    k1, k2, k3, k4 = jax.random.split(key, 4)
    bound1 = 1.0 / jnp.sqrt(obs_size)
    bound2 = 1.0 / jnp.sqrt(hidden_size)
    w1 = jax.random.uniform(k1, (obs_size, hidden_size),
                            minval=-bound1, maxval=bound1, dtype=jnp.float32)
    b1 = jax.random.uniform(k2, (1, hidden_size),
                            minval=-bound1, maxval=bound1, dtype=jnp.float32)
    w2 = jax.random.uniform(k3, (hidden_size, n_actions),
                            minval=-bound2, maxval=bound2, dtype=jnp.float32)
    b2 = jax.random.uniform(k4, (1, n_actions),
                            minval=-bound2, maxval=bound2, dtype=jnp.float32)
    return w1, b1, w2, b2


def pad_params(w1, b1, w2, b2):
    """One-time (init-time) padding of the hidden dim to a multiple of 128.
    Exact: padded W1 cols / b1 cols are zero -> ReLU(0)=0 -> padded W2 rows are
    zero so they contribute nothing.  obs / n_actions are left unpadded so they
    match the unpadded x and output."""
    obs, hidden = w1.shape
    n_actions = w2.shape[1]
    hid_p = _round_up(hidden, 128)
    w1p = jnp.zeros((obs, hid_p), w1.dtype).at[:, :hidden].set(w1)
    b1p = jnp.zeros((1, hid_p), b1.dtype).at[:, :hidden].set(b1)
    w2p = jnp.zeros((hid_p, n_actions), w2.dtype).at[:hidden, :].set(w2)
    return w1p, b1p, w2p, b2


if __name__ == "__main__":
    # CartPole-like sizes: obs_size=4, hidden=32, n_actions=2.
    obs_size, hidden_size, n_actions = 4, 32, 2

    key = jax.random.PRNGKey(0)
    kx, kp, kx2 = jax.random.split(key, 3)
    w1, b1, w2, b2 = init_params(kp, obs_size, hidden_size, n_actions)
    w1p, b1p, w2p, b2p = pad_params(w1, b1, w2, b2)   # hoisted out of forward

    def ref_fwd(x):
        return jnp.maximum(x @ w1 + b1, 0.0) @ w2 + b2

    # Check 1: tiny batch (single tile).
    x_small = jax.random.normal(kx, (8, obs_size), dtype=jnp.float32)
    out_small = neural_net_forward(x_small, w1p, b1p, w2p, b2p)
    jax.block_until_ready(out_small)
    assert out_small.shape == (8, n_actions)
    assert jnp.allclose(out_small, ref_fwd(x_small), atol=1e-5, rtol=1e-5)

    # Check 2: batch not a tile multiple -> exercises multi-tile grid (>=2 tiles
    # for megacore) and the partial last block.
    x_big = jax.random.normal(kx2, (200, obs_size), dtype=jnp.float32)
    out_big = neural_net_forward(x_big, w1p, b1p, w2p, b2p)
    jax.block_until_ready(out_big)
    assert out_big.shape == (200, n_actions)
    assert jnp.allclose(out_big, ref_fwd(x_big), atol=1e-5, rtol=1e-5)

    print("KERNEL_OK")
</pallas_src>

<mosaic_0001>
module attributes {stable_mosaic.version = 11 : i64} {
  func.func @mlp_kernel(%arg0: i32, %arg1: memref<8x4xf32, #tpu.memory_space<vmem>>, %arg2: memref<4x128xf32, #tpu.memory_space<vmem>>, %arg3: memref<1x128xf32, #tpu.memory_space<vmem>>, %arg4: memref<128x2xf32, #tpu.memory_space<vmem>>, %arg5: memref<1x2xf32, #tpu.memory_space<vmem>>, %arg6: memref<8x2xf32, #tpu.memory_space<vmem>>) attributes {dimension_semantics = [#tpu.dimension_semantics<parallel>], iteration_bounds = array<i64: 1>, scalar_prefetch = 0 : i64, scratch_operands = 0 : i64, tpu.core_type = #tpu.core_type<tc>, window_params = [{transform_indices = @transform_0, window_bounds = array<i64: 8, 4>}, {pipeline_mode = #tpu.pipeline_mode<synchronous>, transform_indices = @transform_1, window_bounds = array<i64: 4, 128>}, {pipeline_mode = #tpu.pipeline_mode<synchronous>, transform_indices = @transform_2, window_bounds = array<i64: 1, 128>}, {pipeline_mode = #tpu.pipeline_mode<synchronous>, transform_indices = @transform_3, window_bounds = array<i64: 128, 2>}, {pipeline_mode = #tpu.pipeline_mode<synchronous>, transform_indices = @transform_4, window_bounds = array<i64: 1, 2>}, {transform_indices = @transform_5, window_bounds = array<i64: 8, 2>}]} {
    %c0 = arith.constant 0 : index
    %c0_0 = arith.constant 0 : index
    %0 = vector.load %arg1[%c0, %c0_0] : memref<8x4xf32, #tpu.memory_space<vmem>>, vector<8x4xf32>
    %c0_1 = arith.constant 0 : index
    %c0_2 = arith.constant 0 : index
    %1 = vector.load %arg2[%c0_1, %c0_2] : memref<4x128xf32, #tpu.memory_space<vmem>>, vector<4x128xf32>
    %cst = arith.constant dense<0.000000e+00> : vector<8x128xf32>
    %2 = tpu.matmul %0, %1, %cst {dimension_numbers = #tpu.dot_dimension_numbers<[1], [0], [0], [1], [0, 0, 1, 1], [], []>, precision = #tpu.contract_precision<fp32>} : vector<8x4xf32>, vector<4x128xf32>, vector<8x128xf32> -> vector<8x128xf32>
    %c0_3 = arith.constant 0 : index
    %c0_4 = arith.constant 0 : index
    %3 = vector.load %arg3[%c0_3, %c0_4] : memref<1x128xf32, #tpu.memory_space<vmem>>, vector<1x128xf32>
    %4 = vector.broadcast %3 : vector<1x128xf32> to vector<8x128xf32>
    %5 = arith.addf %2, %4 : vector<8x128xf32>
    %cst_5 = arith.constant 0.000000e+00 : f32
    %6 = vector.broadcast %cst_5 : f32 to vector<8x128xf32>
    %7 = arith.maximumf %5, %6 : vector<8x128xf32>
    %c0_6 = arith.constant 0 : index
    %c0_7 = arith.constant 0 : index
    %8 = vector.load %arg4[%c0_6, %c0_7] : memref<128x2xf32, #tpu.memory_space<vmem>>, vector<128x2xf32>
    %cst_8 = arith.constant dense<0.000000e+00> : vector<8x2xf32>
    %9 = tpu.matmul %7, %8, %cst_8 {dimension_numbers = #tpu.dot_dimension_numbers<[1], [0], [0], [1], [0, 0, 1, 1], [], []>, precision = #tpu.contract_precision<fp32>} : vector<8x128xf32>, vector<128x2xf32>, vector<8x2xf32> -> vector<8x2xf32>
    %c0_9 = arith.constant 0 : index
    %c0_10 = arith.constant 0 : index
    %10 = vector.load %arg5[%c0_9, %c0_10] : memref<1x2xf32, #tpu.memory_space<vmem>>, vector<1x2xf32>
    %11 = vector.broadcast %10 : vector<1x2xf32> to vector<8x2xf32>
    %12 = arith.addf %9, %11 : vector<8x2xf32>
    %c0_11 = arith.constant 0 : index
    %c0_12 = arith.constant 0 : index
    %13 = vector.load %arg6[%c0_11, %c0_12] : memref<8x2xf32, #tpu.memory_space<vmem>>, vector<8x2xf32>
    tpu.vector_store %arg6[%c0_11, %c0_12], %12 {strides = array<i32>} : memref<8x2xf32, #tpu.memory_space<vmem>>, vector<8x2xf32>,
    return
  }
  func.func @transform_0(%arg0: i32) -> (i32, i32) {
    %c0_i32 = arith.constant 0 : i32
    %c0_i32_0 = arith.constant 0 : i32
    return %arg0, %c0_i32 : i32, i32
  }
  func.func @transform_1(%arg0: i32) -> (i32, i32) {
    %c0_i32 = arith.constant 0 : i32
    %c0_i32_0 = arith.constant 0 : i32
    %c0_i32_1 = arith.constant 0 : i32
    return %c0_i32, %c0_i32_0 : i32, i32
  }
  func.func @transform_2(%arg0: i32) -> (i32, i32) {
    %c0_i32 = arith.constant 0 : i32
    %c0_i32_0 = arith.constant 0 : i32
    %c0_i32_1 = arith.constant 0 : i32
    return %c0_i32, %c0_i32_0 : i32, i32
  }
  func.func @transform_3(%arg0: i32) -> (i32, i32) {
    %c0_i32 = arith.constant 0 : i32
    %c0_i32_0 = arith.constant 0 : i32
    %c0_i32_1 = arith.constant 0 : i32
    return %c0_i32, %c0_i32_0 : i32, i32
  }
  func.func @transform_4(%arg0: i32) -> (i32, i32) {
    %c0_i32 = arith.constant 0 : i32
    %c0_i32_0 = arith.constant 0 : i32
    %c0_i32_1 = arith.constant 0 : i32
    return %c0_i32, %c0_i32_0 : i32, i32
  }
  func.func @transform_5(%arg0: i32) -> (i32, i32) {
    %c0_i32 = arith.constant 0 : i32
    %c0_i32_0 = arith.constant 0 : i32
    return %arg0, %c0_i32 : i32, i32
  }
}

</mosaic_0001>

<bundles_post_ra>
// kernel: tpu_custom_call.1
= control target key start
LH: loop header
LB: loop body
LE: loop exit
PB: predicated region body
PF: predicated region fallthrough
CT: control target
= control target key end

     0   :  { %vm33_vm0 = vcmask 1043456   ;;  %vm29_vm1 = vcmask 31744   ;;  %v1677_v0 = vmov 0.0   ;;  %vm1678_vm2 = vmmov 0   ;;  %s2036_s1 = inlined_call_operand.vmem [shape: f32[4,128], index: 1, kind: input, shape index: {}]   ;;  %s2037_s0 = inlined_call_operand.vmem [shape: f32[8,4], index: 0, kind: input, shape index: {}]   ;;  %s2038_s3 = inlined_call_operand.vmem [shape: f32[128,2], index: 3, kind: input, shape index: {}]   ;;  %s2039_s2 = inlined_call_operand.vmem [shape: f32[1,128], index: 2, kind: input, shape index: {}]   ;;  %s2040_s4 = inlined_call_operand.vmem [shape: f32[1,2], index: 4, kind: input, shape index: {}]   ;;  %s2041_s5 = inlined_call_operand.vmem [shape: f32[8,2], index: 5, kind: output, shape index: {}]  }
   0x1   :  { %1285 = vmatprep.subr.mxu0 %v1677_v0  ;;  %v21_v1 = vld [vmem:[%s2036_s1] sm:$0xf]  ;;  %1287 = vmatprep.mubr.msk.f32.mxu0 %vm1678_vm2, %v1677_v0  ;;  %v485_v6 = vld [vmem:[%s2038_s3 + $0x8] sm:$0xff]  ;;  %v486_v8 = vld [vmem:[%s2038_s3 + $0x10] sm:$0xff]  ;;  %v1679_v39 = vmov 0.0|0.0   ;;  %vm1148_vm3 = vcmask 15360  }
   0x2   :  { %v20_v2 = vld [vmem:[%s2037_s0] sm:$0xff]  ;;  %v35_v4 = vsel %vm33_vm0, %v21_v1, 0  ;;  %1270 = vmatprep.subr.mxu1 %v1677_v0  ;;  %1272 = vmatprep.mubr.msk.f32.mxu1 %vm1678_vm2, %v1677_v0  ;;  %v487_v9 = vld [vmem:[%s2038_s3 + $0x18] sm:$0xff]  ;;  %v489_v13 = vld [vmem:[%s2038_s3 + $0x28] sm:$0xff]  ;;  %v511_v14 = vand.u32 4294901760, %v485_v6  ;;  %v514_v16 = vand.u32 4294901760, %v486_v8 }
   0x3   :  { %v484_v3 = vld [vmem:[%s2038_s3] sm:$0xff]  ;;  %v31_v5 = vsel %vm29_vm1, %v20_v2, 0  ;;  %v38_v10 = vand.u32 4294901760, %v35_v4  ;;  %v490_v17 = vld [vmem:[%s2038_s3 + $0x30] sm:$0xff]  ;;  %v491_v18 = vld [vmem:[%s2038_s3 + $0x38] sm:$0xff]  ;;  %v517_v21 = vand.u32 4294901760, %v487_v9 }
   0x4   :  { %v508_v7 = vand.u32 4294901760, %v484_v3  ;;  %v103_v11 = vand.u32 4294901760, %v31_v5  ;;  %v488_v12 = vld [vmem:[%s2038_s3 + $0x20] sm:$0xff]  ;;  %v1750_v23 = vsub.f32 %v485_v6, %v511_v14  ;;  %v1752_v24 = vsub.f32 %v486_v8, %v514_v16  ;;  %v493_v45 = vld [vmem:[%s2038_s3 + $0x48] sm:$0xff]  ;;  %v494_v49 = vld [vmem:[%s2038_s3 + $0x50] sm:$0xff] }
   0x5   :  { %v115_v19 = vsub.f32 %v35_v4, %v38_v10  ;;  %1286 = vmatpush3.msra.mxu0 %v38_v10  ;;  %1271 = vmatpush3.msra.mxu1 %v38_v10  ;;  %v520_v22 = vand.u32 4294901760, %v488_v12  ;;  %v523_v25 = vand.u32 4294901760, %v489_v13  ;;  %v526_v26 = vand.u32 4294901760, %v490_v17  ;;  %v492_v44 = vld [vmem:[%s2038_s3 + $0x40] sm:$0xff]  ;;  %v495_v50 = vld [vmem:[%s2038_s3 + $0x58] sm:$0xff]  ;;  %v497_v57 = vld [vmem:[%s2038_s3 + $0x68] sm:$0xff] }
   0x6   :  { %v1740_v15 = vsub.f32 %v484_v3, %v508_v7  ;;  %v104_v20 = vsub.f32 %v31_v5, %v103_v11  ;;  %1275 = vmatprep.subr.mxu1 %v1677_v0  ;;  %1290 = vmatprep.subr.mxu0 %v1677_v0  ;;  %v1754_v29 = vsub.f32 %v487_v9, %v517_v21  ;;  %v529_v30 = vand.u32 4294901760, %v491_v18  ;;  %v496_v56 = vld [vmem:[%s2038_s3 + $0x60] sm:$0xff]  ;;  %v498_v61 = vld [vmem:[%s2038_s3 + $0x70] sm:$0xff]  ;;  %v499_v62 = vld [vmem:[%s2038_s3 + $0x78] sm:$0xff] }
   0x7   :  { %v116_v28 = vand.u32 4294901760, %v115_v19  ;;  %v1756_v31 = vsub.f32 %v488_v12, %v520_v22  ;;  %v1758_v32 = vsub.f32 %v489_v13, %v523_v25  ;;  %v1760_v33 = vsub.f32 %v490_v17, %v526_v26 }
   0x8   :  { %v105_v27 = vand.u32 4294901760, %v104_v20  ;;  %v1762_v36 = vsub.f32 %v491_v18, %v529_v30  ;;  %v1776_v40 = vpack.c.bf16 %v511_v14, %v508_v7  ;;  %v1782_v41 = vpack.c.bf16 %v517_v21, %v514_v16 }
   0x9   :  { %v117_v35 = vsub.f32 %v115_v19, %v116_v28  ;;  %v1788_v42 = vpack.c.bf16 %v523_v25, %v520_v22  ;;  %v1796_v43 = vpack.c.bf16 %v529_v30, %v526_v26  ;;  %v532_v46 = vand.u32 4294901760, %v492_v44 }
   0xa   :  { %1288 = vmatmul.mubr.f32.vlgmr.msra.gmra.mrb[0].mxu0 %v105_v27  ;;  %v106_v34 = vsub.f32 %v104_v20, %v105_v27  ;;  %v535_v47 = vand.u32 4294901760, %v493_v45  ;;  %v538_v53 = vand.u32 4294901760, %v494_v49  ;;  %v541_v54 = vand.u32 4294901760, %v495_v50 }
   0xb   :  { %1291 = vmatpush3.msra.mxu0 %v116_v28  ;;  %1292 = vmatprep.mubr.msk.f32.mxu0 %vm1678_vm2, %v1677_v0  ;;  %v118_v38 = vand.u32 4294901760, %v117_v35  ;;  %v1818_v51 = vsub.f32 %v492_v44, %v532_v46  ;;  %v544_v58 = vand.u32 4294901760, %v496_v56  ;;  %v547_v59 = vand.u32 4294901760, %v497_v57 }
   0xc   :  { %v107_v37 = vand.u32 4294901760, %v106_v34  ;;  %1295 = vmatprep.subr.mxu0 %v1677_v0  ;;  %v1810_v48 = vpack.c.bf16 %v535_v47, %v532_v46  ;;  %v1820_v52 = vsub.f32 %v493_v45, %v535_v47  ;;  %v1826_v55 = vpack.c.bf16 %v541_v54, %v538_v53 }
   0xd   :  { %v1838_v60 = vpack.c.bf16 %v547_v59, %v544_v58  ;;  %v550_v63 = vand.u32 4294901760, %v498_v61  ;;  %v553_v1 = vand.u32 4294901760, %v499_v62  ;;  %v1852_v3 = vsub.f32 %v494_v49, %v538_v53 }
   0xe   :  { %1273 = vmatmul.mubr.f32.vlgmr.msra.gmra.mrb[0].mxu1 %v107_v37  ;;  %v1854_v4 = vsub.f32 %v495_v50, %v541_v54  ;;  %v1856_v5 = vsub.f32 %v496_v56, %v544_v58  ;;  %v1858_v6 = vsub.f32 %v497_v57, %v547_v59  ;;  %v601_v9 = vand.u32 4294901760, %v1740_v15 }
   0xf   :  { %1276 = vmatpush3.msra.mxu1 %v118_v38  ;;  %1277 = vmatprep.mubr.msk.f32.mxu1 %vm1678_vm2, %v1677_v0  ;;  %v1850_v2 = vpack.c.bf16 %v553_v1, %v550_v63  ;;  %v1861_v7 = vsub.f32 %v498_v61, %v550_v63  ;;  %v1863_v8 = vsub.f32 %v499_v62, %v553_v1  ;;  %v615_v17 = vand.u32 4294901760, %v1752_v24 }
  0x10   :  { %1280 = vmatprep.subr.mxu1 %v1677_v0  ;;  %v602_v12 = vsub.f32 %v1740_v15, %v601_v9  ;;  %v622_v18 = vand.u32 4294901760, %v1754_v29  ;;  %v629_v27 = vand.u32 4294901760, %v1756_v31  ;;  %v636_v28 = vand.u32 4294901760, %v1758_v32 }
  0x11   :  { %v616_v21 = vsub.f32 %v1752_v24, %v615_v17  ;;  %v643_v45 = vand.u32 4294901760, %v1760_v33  ;;  %v650_v46 = vand.u32 4294901760, %v1762_v36  ;;  %v657_v57 = vand.u32 4294901760, %v1818_v51 }
  0x12   :  { %1293 = vmatmul.mubr.f32.vlgmr.msra.gmra.mrb[0].mxu0 %v103_v11  ;;  %v603_v14 = vand.u32 4294901760, %v602_v12  ;;  %v623_v22 = vsub.f32 %v1754_v29, %v622_v18  ;;  %v1886_v34 = vpack.c.bf16 %v636_v28, %v629_v27  ;;  %v630_v35 = vsub.f32 %v1756_v31, %v629_v27 }
  0x13   :  { %1296 = vmatpush3.msra.mxu0 %v38_v10  ;;  %1297 = vmatprep.mubr.msk.f32.mxu0 %vm1678_vm2, %v1677_v0  ;;  %v608_v10 = vand.u32 4294901760, %v1750_v23  ;;  %v617_v25 = vand.u32 4294901760, %v616_v21  ;;  %v637_v37 = vsub.f32 %v1758_v32, %v636_v28  ;;  %v1894_v49 = vpack.c.bf16 %v650_v46, %v643_v45 }
  0x14   :  { %1510 = vmatprep.subr.bf16.mxu0 %v1679_v39  ;;  %v624_v26 = vand.u32 4294901760, %v623_v22  ;;  %v631_v38 = vand.u32 4294901760, %v630_v35  ;;  %v644_v50 = vsub.f32 %v1760_v33, %v643_v45  ;;  %v651_v53 = vsub.f32 %v1762_v36, %v650_v46 }
  0x15   :  { %v609_v13 = vsub.f32 %v1750_v23, %v608_v10  ;;  %v638_v44 = vand.u32 4294901760, %v637_v37  ;;  %v664_v58 = vand.u32 4294901760, %v1820_v52  ;;  %v658_v62 = vsub.f32 %v1818_v51, %v657_v57 }
  0x16   :  { %1278 = vmatmul.mubr.f32.vlgmr.msra.gmra.mrb[0].mxu1 %v103_v11  ;;  %v1884_v30 = vpack.c.bf16 %v624_v26, %v617_v25  ;;  %v645_v54 = vand.u32 4294901760, %v644_v50  ;;  %v652_v56 = vand.u32 4294901760, %v651_v53  ;;  %v678_v12 = vand.u32 4294901760, %v1854_v4 }
  0x17   :  { %1281 = vmatpush3.msra.mxu1 %v115_v19  ;;  %1282 = vmatprep.mubr.msk.f32.mxu1 %vm1678_vm2, %v1677_v0  ;;  %v610_v16 = vand.u32 4294901760, %v609_v13  ;;  %v1892_v47 = vpack.c.bf16 %v638_v44, %v631_v38  ;;  %v1902_v61 = vpack.c.bf16 %v664_v58, %v657_v57  ;;  %v665_v63 = vsub.f32 %v1820_v52, %v664_v58 }
  0x18   :  { %1582 = vmatprep.subr.bf16.mxu1 %v1679_v39  ;;  %v1900_v59 = vpack.c.bf16 %v652_v56, %v645_v54  ;;  %v659_v1 = vand.u32 4294901760, %v658_v62  ;;  %v685_v22 = vand.u32 4294901760, %v1856_v5  ;;  %v692_v25 = vand.u32 4294901760, %v1858_v6 }
  0x19   :  { %v1876_v19 = vpack.c.bf16 %v610_v16, %v603_v14  ;;  %v699_v44 = vand.u32 4294901760, %v1861_v7  ;;  %v706_v45 = vand.u32 4294901760, %v1863_v8  ;;  %v1559_v62 = vpack.c.bf16 %v1750_v23, %v1740_v15 }
  0x1a   :  { %1298 = vmatmul.mubr.f32.vlgmr.msra.gmra.mrb[0].mxu0 %v103_v11  ;;  %v1870_v11 = vpack.c.bf16 %v608_v10, %v601_v9  ;;  %v666_v9 = vand.u32 4294901760, %v665_v63  ;;  %v671_v10 = vand.u32 4294901760, %v1852_v3  ;;  %v1625_v27 = vpack.c.bf16 %v692_v25, %v685_v22 }
  0x1b   :  { %1512 = vmatpush3.bf16.msra.mxu0 %v1776_v40  ;;  %1332 = vmatprep.mubr.msk.f32.mxu0 %vm1678_vm2, %v1677_v0  ;;  %v686_v28 = vsub.f32 %v1856_v5, %v685_v22  ;;  %v693_v35 = vsub.f32 %v1858_v6, %v692_v25  ;;  %v1628_v50 = vpack.c.bf16 %v706_v45, %v699_v44 }
  0x1c   :  { %1513 = vmatprep.subr.bf16.mxu0 %v1679_v39  ;;  %v1908_v13 = vpack.c.bf16 %v666_v9, %v659_v1  ;;  %v1910_v14 = vpack.c.bf16 %v678_v12, %v671_v10  ;;  %v672_v16 = vsub.f32 %v1852_v3, %v671_v10  ;;  %v700_v53 = vsub.f32 %v1861_v7, %v699_v44 }
  0x1d   :  { %v687_v37 = vand.u32 4294901760, %v686_v28  ;;  %v694_v38 = vand.u32 4294901760, %v693_v35  ;;  %v707_v54 = vsub.f32 %v1863_v8, %v706_v45  ;;  %v1562_v63 = vpack.c.bf16 %v1754_v29, %v1752_v24  ;;  %v1155_v29 = vld [vmem:[%s2040_s4] ss:$0 sm:$0xff] }
  0x1e   :  { %1283 = vmatmul.mubr.f32.vlgmr.msra.gmra.mrb[0].mxu1 %v104_v20  ;;  %v1878_v20 = vpack.c.bf16 %v622_v18, %v615_v17  ;;  %v679_v17 = vsub.f32 %v1854_v4, %v678_v12  ;;  %v673_v18 = vand.u32 4294901760, %v672_v16  ;;  %v701_v56 = vand.u32 4294901760, %v700_v53 }
  0x1f   :  { %1584 = vmatpush3.bf16.msra.mxu1 %v1776_v40  ;;  %1515 = vmatpush3.bf16.msra.mxu0 %v1782_v41  ;;  %v1553_v46 = vpack.c.bf16 %v694_v38, %v687_v37  ;;  %v708_v57 = vand.u32 4294901760, %v707_v54  ;;  %v1565_v1 = vpack.c.bf16 %v1758_v32, %v1756_v31  ;;  %v1568_v9 = vpack.c.bf16 %v1762_v36, %v1760_v33 }
  0x20   :  { %1585 = vmatprep.subr.bf16.mxu1 %v1679_v39  ;;  %1516 = vmatprep.subr.bf16.mxu0 %v1679_v39  ;;  %v680_v21 = vand.u32 4294901760, %v679_v17  ;;  %v1571_v10 = vpack.c.bf16 %v1820_v52, %v1818_v51  ;;  %v1574_v12 = vpack.c.bf16 %v1854_v4, %v1852_v3  ;;  %v1577_v16 = vpack.c.bf16 %v1858_v6, %v1856_v5 }
  0x21   :  { %1437 = vmatprep.mubr.msk.f32.mxu1 %vm1678_vm2, %v1677_v0  ;;  %v1556_v58 = vpack.c.bf16 %v708_v57, %v701_v56  ;;  %v1580_v15 = vpack.c.bf16 %v1863_v8, %v1861_v7 }
  0x22   :  { %v1550_v26 = vpack.c.bf16 %v680_v21, %v673_v18  ;;  %v1154_v18 = vld [vmem:[%s2039_s2] ss:$0 sm:$0xff] }
  0x23   :  { %1587 = vmatpush3.bf16.msra.mxu1 %v1782_v41  ;;  %1518 = vmatpush3.bf16.msra.mxu0 %v1788_v42 }
  0x24   :  { %1588 = vmatprep.subr.bf16.mxu1 %v1679_v39  ;;  %1519 = vmatprep.subr.bf16.mxu0 %v1679_v39 }
  0x27   :  { %1590 = vmatpush3.bf16.msra.mxu1 %v1788_v42  ;;  %1521 = vmatpush3.bf16.msra.mxu0 %v1796_v43 }
  0x28   :  { %1591 = vmatprep.subr.bf16.mxu1 %v1679_v39  ;;  %1522 = vmatprep.subr.bf16.mxu0 %v1679_v39 }
  0x2b   :  { %1593 = vmatpush3.bf16.msra.mxu1 %v1796_v43  ;;  %1524 = vmatpush3.bf16.msra.mxu0 %v1810_v48 }
  0x2c   :  { %1594 = vmatprep.subr.bf16.mxu1 %v1679_v39  ;;  %1525 = vmatprep.subr.bf16.mxu0 %v1679_v39 }
  0x2f   :  { %1596 = vmatpush3.bf16.msra.mxu1 %v1810_v48  ;;  %1527 = vmatpush3.bf16.msra.mxu0 %v1826_v55 }
  0x30   :  { %1597 = vmatprep.subr.bf16.mxu1 %v1679_v39  ;;  %1528 = vmatprep.subr.bf16.mxu0 %v1679_v39 }
  0x33   :  { %1599 = vmatpush3.bf16.msra.mxu1 %v1826_v55  ;;  %1530 = vmatpush3.bf16.msra.mxu0 %v1838_v60 }
  0x34   :  { %1600 = vmatprep.subr.bf16.mxu1 %v1679_v39  ;;  %1531 = vmatprep.subr.bf16.mxu0 %v1679_v39 }
  0x37   :  { %1602 = vmatpush3.bf16.msra.mxu1 %v1838_v60  ;;  %1533 = vmatpush3.bf16.msra.mxu0 %v1850_v2 }
  0x38   :  { %1603 = vmatprep.subr.bf16.mxu1 %v1679_v39  ;;  %1534 = vmatprep.subr.bf16.mxu0 %v1679_v39 }
  0x3b   :  { %1605 = vmatpush3.bf16.msra.mxu1 %v1850_v2 }
  0x3c   :  { %1606 = vmatprep.subr.bf16.mxu1 %v1679_v39 }
  0xed   :  { %v479_v23 = vpop.f32.mrb[0].mxu0 }
  0xee   :  { %v1299_v17 = vpop.f32.mrb[1].mxu0 }
  0xf1   :  { %v259_v21 = vpop.f32.mrb[0].mxu1 }
  0xf2   :  { %v1654_v22 = vadd.f32 %v1154_v18, %v259_v21  ;;  %v1284_v25 = vpop.f32.mrb[1].mxu1 }
  0xf4   :  { %v1655_v28 = vadd.f32 %v1654_v22, %v479_v23 }
  0xf6   :  { %v483_v35 = vmax.f32 %v1655_v28, 0.0 }
  0xf8   :  { %v1941_v37 = vand.u32 4294901760, %v483_v35 }
  0xfa   :  { %v1944_v38 = vsub.f32 %v483_v35, %v1941_v37 }
  0xfc   :  { %v590_v44 = vand.u32 4294901760, %v1944_v38 }
  0xfe   :  { %1438 = vmatmul.mubr.f32.vlgmr.msra.gmra.mrb[2].mxu1 %v590_v44  ;;  %v591_v45 = vsub.f32 %v1944_v38, %v590_v44 }
  0xff   :  { %1608 = vmatpush3.bf16.msra.mxu1 %v1870_v11  ;;  %1472 = vmatprep.mubr.msk.f32.mxu1 %vm1678_vm2, %v1677_v0 }
 0x100   :  { %1609 = vmatprep.subr.bf16.mxu1 %v1679_v39  ;;  %v592_v53 = vand.u32 4294901760, %v591_v45 }
 0x102   :  { %1333 = vmatmul.mubr.f32.vlgmr.msra.gmra.mrb[2].mxu0 %v592_v53 }
 0x103   :  { %1536 = vmatpush3.bf16.msra.mxu0 %v1876_v19  ;;  %1611 = vmatpush3.bf16.msra.mxu1 %v1878_v20 }
 0x104   :  { %1537 = vmatprep.subr.bf16.mxu0 %v1679_v39  ;;  %1612 = vmatprep.subr.bf16.mxu1 %v1679_v39 }
 0x105   :  { %1367 = vmatprep.mubr.msk.f32.mxu0 %vm1678_vm2, %v1677_v0 }
 0x107   :  { %1539 = vmatpush3.bf16.msra.mxu0 %v1884_v30  ;;  %1614 = vmatpush3.bf16.msra.mxu1 %v1886_v34 }
 0x108   :  { %1540 = vmatprep.subr.bf16.mxu0 %v1679_v39  ;;  %1615 = vmatprep.subr.bf16.mxu1 %v1679_v39 }
 0x10b   :  { %1542 = vmatpush3.bf16.msra.mxu0 %v1892_v47  ;;  %1617 = vmatpush3.bf16.msra.mxu1 %v1894_v49 }
 0x10c   :  { %1543 = vmatprep.subr.bf16.mxu0 %v1679_v39  ;;  %1618 = vmatprep.subr.bf16.mxu1 %v1679_v39 }
 0x10f   :  { %1545 = vmatpush3.bf16.msra.mxu0 %v1900_v59  ;;  %1620 = vmatpush3.bf16.msra.mxu1 %v1902_v61 }
 0x110   :  { %1546 = vmatprep.subr.bf16.mxu0 %v1679_v39  ;;  %1621 = vmatprep.subr.bf16.mxu1 %v1679_v39 }
 0x113   :  { %1548 = vmatpush3.bf16.msra.mxu0 %v1908_v13  ;;  %1623 = vmatpush3.bf16.msra.mxu1 %v1910_v14 }
 0x114   :  { %1549 = vmatprep.subr.bf16.mxu0 %v1679_v39  ;;  %1624 = vmatprep.subr.bf16.mxu1 %v1679_v39 }
 0x117   :  { %1551 = vmatpush3.bf16.msra.mxu0 %v1550_v26  ;;  %1626 = vmatpush3.bf16.msra.mxu1 %v1625_v27 }
 0x118   :  { %1552 = vmatprep.subr.bf16.mxu0 %v1679_v39  ;;  %1627 = vmatprep.subr.bf16.mxu1 %v1679_v39 }
 0x11b   :  { %1554 = vmatpush3.bf16.msra.mxu0 %v1553_v46  ;;  %1629 = vmatpush3.bf16.msra.mxu1 %v1628_v50 }
 0x11c   :  { %1555 = vmatprep.subr.bf16.mxu0 %v1679_v39  ;;  %1630 = vmatprep.subr.bf16.mxu1 %v1679_v39 }
 0x11e   :  { %1473 = vmatmul.mubr.f32.vlgmr.msra.gmra.mrb[2].mxu1 %v1941_v37 }
 0x11f   :  { %1557 = vmatpush3.bf16.msra.mxu0 %v1556_v58  ;;  %1632 = vmatpush3.bf16.msra.mxu1 %v1776_v40 }
 0x120   :  { %1558 = vmatprep.subr.bf16.mxu0 %v1679_v39  ;;  %1633 = vmatprep.subr.bf16.mxu1 %v1679_v39 }
 0x121   :  { %1507 = vmatprep.mubr.msk.f32.mxu1 %vm1678_vm2, %v1677_v0 }
 0x122   :  { %1368 = vmatmul.mubr.f32.vlgmr.msra.gmra.mrb[2].mxu0 %v1941_v37 }
 0x123   :  { %1560 = vmatpush3.bf16.msra.mxu0 %v1559_v62  ;;  %1635 = vmatpush3.bf16.msra.mxu1 %v1782_v41 }
 0x124   :  { %1561 = vmatprep.subr.bf16.mxu0 %v1679_v39  ;;  %1636 = vmatprep.subr.bf16.mxu1 %v1679_v39 }
 0x125   :  { %1402 = vmatprep.mubr.msk.f32.mxu0 %vm1678_vm2, %v1677_v0 }
 0x127   :  { %1563 = vmatpush3.bf16.msra.mxu0 %v1562_v63  ;;  %1638 = vmatpush3.bf16.msra.mxu1 %v1788_v42 }
 0x128   :  { %1564 = vmatprep.subr.bf16.mxu0 %v1679_v39  ;;  %1639 = vmatprep.subr.bf16.mxu1 %v1679_v39 }
 0x12b   :  { %1566 = vmatpush3.bf16.msra.mxu0 %v1565_v1  ;;  %1641 = vmatpush3.bf16.msra.mxu1 %v1796_v43 }
 0x12c   :  { %1567 = vmatprep.subr.bf16.mxu0 %v1679_v39  ;;  %1642 = vmatprep.subr.bf16.mxu1 %v1679_v39 }
 0x12f   :  { %1569 = vmatpush3.bf16.msra.mxu0 %v1568_v9  ;;  %1644 = vmatpush3.bf16.msra.mxu1 %v1810_v48 }
 0x130   :  { %1570 = vmatprep.subr.bf16.mxu0 %v1679_v39  ;;  %1645 = vmatprep.subr.bf16.mxu1 %v1679_v39 }
 0x133   :  { %1572 = vmatpush3.bf16.msra.mxu0 %v1571_v10  ;;  %1647 = vmatpush3.bf16.msra.mxu1 %v1826_v55 }
 0x134   :  { %1573 = vmatprep.subr.bf16.mxu0 %v1679_v39  ;;  %1648 = vmatprep.subr.bf16.mxu1 %v1679_v39 }
 0x137   :  { %1575 = vmatpush3.bf16.msra.mxu0 %v1574_v12  ;;  %1650 = vmatpush3.bf16.msra.mxu1 %v1838_v60 }
 0x138   :  { %1576 = vmatprep.subr.bf16.mxu0 %v1679_v39  ;;  %1651 = vmatprep.subr.bf16.mxu1 %v1679_v39 }
 0x13b   :  { %1578 = vmatpush3.bf16.msra.mxu0 %v1577_v16  ;;  %1653 = vmatpush3.bf16.msra.mxu1 %v1850_v2 }
 0x13c   :  { %1579 = vmatprep.subr.bf16.mxu0 %v1679_v39 }
 0x13e   :  { %1508 = vmatmul.mubr.f32.vlgmr.msra.gmra.mrb[2].mxu1 %v1941_v37 }
 0x13f   :  { %1581 = vmatpush3.bf16.msra.mxu0 %v1580_v15 }
 0x142   :  { %1403 = vmatmul.mubr.f32.vlgmr.msra.gmra.mrb[2].mxu0 %v1944_v38 }
 0x211   :  { %v1144_v0 = vpop.f32.mrb[2].mxu1 }
 0x212   :  { %v1509_v24 = vpop.f32.mrb[3].mxu1 }
 0x215   :  { %v849_v31 = vpop.f32.mrb[2].mxu0 }
 0x216   :  { %v1656_v32 = vadd.f32 %v1155_v29, %v849_v31  ;;  %v1404_v33 = vpop.f32.mrb[3].mxu0 }
 0x218   :  { %v1657_v36 = vadd.f32 %v1656_v32, %v1144_v0 }
 0x21a   :  { %1149 = vst.msk [vmem:[%s2041_s5] sm:$0xff] %vm1148_vm3, %v1657_v36 }

</bundles_post_ra>
